<compile_context>
chip_gen: v5e
topology: v5e:2x2
jax: 0.10.0
libtpu: 0.0.40
codegen_flags: <defaults>
</compile_context>

<pallas_src>
import math

import jax
import jax.numpy as jnp
from jax import lax
from jax.experimental import pallas as pl
from jax.experimental.pallas import tpu as pltpu

_MiB = 1024 * 1024
_NEG_INF = -1e30  # finite "-inf": avoids inf-inf -> NaN in masked / online softmax


def _round_up(n, m):
    return ((n + m - 1) // m) * m


def _mxu_cast(v):
    """Feed the MXU bf16 when given f32 (accumulation stays f32 via
    preferred_element_type); sub-f32 dtypes are used as-is."""
    return v.astype(jnp.bfloat16) if v.dtype == jnp.float32 else v


def _vmem_capacity_bytes():
    try:
        return int(pltpu.get_tpu_info().vmem_capacity_bytes)
    except Exception:
        pass
    try:
        kind = jax.devices()[0].device_kind.lower()
        return 64 * _MiB if "v7" in kind else 128 * _MiB
    except Exception:
        return 64 * _MiB  # unknown chip: be conservative


def _chip_policy():
    cap = _vmem_capacity_bytes()
    if cap >= 96 * _MiB:  # v5e / v6e: 128 MiB physical VMEM per TensorCore
        return dict(
            vmem_limit_max=96 * _MiB,   # leave headroom below physical
            step_budget=80 * _MiB,      # per-grid-step working-set target
            flash_tq=512, flash_tk=1024,
            monolithic_max_seq=1024,
        )
    # v7x: 64 MiB physical VMEM per TensorCore -> never request 64 MiB scoped
    return dict(
        vmem_limit_max=48 * _MiB,
        step_budget=24 * _MiB,
        flash_tq=256, flash_tk=512,
        monolithic_max_seq=1024,
    )


# ----------------------------------------------------------------------------
# VMEM footprint estimates (count ALL live intermediates, incl. bf16 copies).
# ----------------------------------------------------------------------------
def _monolithic_est(tb, S, Dp, itemsize):
    io = 2 * 2 * tb * S * Dp * itemsize     # double-buffered x-in + out blocks
    scores = 2 * tb * S * S * 4             # s and e, f32
    e_bf16 = tb * S * S * 2                 # bf16 copy fed to the second matmul
    x_bf16 = tb * S * Dp * 2                # in-kernel bf16 cast of x
    ctx = tb * S * Dp * 4                   # f32 accumulator
    stats = 2 * tb * S * 4                  # row max + denom
    return io + scores + e_bf16 + x_bf16 + ctx + stats


def _row_tiled_est(tq, s_pad, Dp, itemsize):
    k_res = 2 * s_pad * Dp * itemsize + s_pad * Dp * 2    # K (dbl-buf) + bf16 copy
    io = 2 * 2 * tq * Dp * itemsize                       # q-in + out, double-buffered
    scores = 2 * tq * s_pad * 4 + tq * s_pad * 2          # s, e f32 + bf16 e copy
    ctx = tq * Dp * 4 + tq * Dp * 2 + 2 * tq * 4          # f32 ctx + bf16 q + stats
    return k_res + io + scores + ctx


def _flash_est(tq, tk, Dp, itemsize):
    return (4 * tq * Dp * itemsize + 2 * tk * Dp * itemsize   # q/out + k blocks
            + (tq + tk) * Dp * 2                              # bf16 casts
            + 2 * tq * tk * 4 + tq * tk * 2                   # s, p f32 + bf16 p
            + tq * Dp * 4 + 2 * tq * 4)                       # acc + stats scratch


# ----------------------------------------------------------------------------
# Kernels
# ----------------------------------------------------------------------------
def _attn_block_kernel(x_ref, o_ref):
    """Monolithic: one (TB, S, Dp) batch tile, full softmax(x @ x^T) @ x."""
    x = _mxu_cast(x_ref[...])                                    # (TB, S, Dp)
    # scores[b,q,k] = sum_d x[b,q,d] * x[b,k,d]  (contraction, no XLU transpose)
    s = lax.dot_general(x, x, (((2,), (2,)), ((0,), (0,))),
                        preferred_element_type=jnp.float32)      # (TB,S,S) f32
    m = jnp.max(s, axis=-1, keepdims=True)
    e = jnp.exp(s - m)                                           # f32 exp + stats
    denom = jnp.sum(e, axis=-1, keepdims=True)
    # Unnormalized context on the MXU (bf16 feed, f32 acc), then one (S, Dp)
    # normalization using the otherwise-idle EUP approx reciprocal.
    ctx = lax.dot_general(e.astype(x.dtype), x, (((2,), (1,)), ((0,), (0,))),
                          preferred_element_type=jnp.float32)    # (TB,S,Dp) f32
    ctx = ctx * pl.reciprocal(denom, approx=True)
    o_ref[...] = ctx.astype(o_ref.dtype)


def _make_row_tiled_kernel(s_true, s_pad):
    """Mid-S path: (tq, Dp) query tile vs. the full (Sp, Dp) keys (VMEM-resident)."""
    masked = s_pad != s_true

    def kernel(q_ref, k_ref, o_ref):
        q = _mxu_cast(q_ref[...])                                # (TQ, Dp)
        k = _mxu_cast(k_ref[...])                                # (Sp, Dp)
        s = lax.dot_general(q, k, (((1,), (1,)), ((), ())),
                            preferred_element_type=jnp.float32)  # (TQ, Sp) f32
        if masked:  # zero-padded key rows are NOT softmax-neutral -> mask them
            col = lax.broadcasted_iota(jnp.int32, s.shape, 1)
            s = jnp.where(col < s_true, s, _NEG_INF)
        m = jnp.max(s, axis=-1, keepdims=True)
        e = jnp.exp(s - m)
        denom = jnp.sum(e, axis=-1, keepdims=True)
        ctx = jnp.dot(e.astype(k.dtype), k, preferred_element_type=jnp.float32)
        ctx = ctx * pl.reciprocal(denom, approx=True)
        o_ref[...] = ctx.astype(o_ref.dtype)

    return kernel


def _make_flash_kernel(s_true, s_pad, tk):
    """Long-S path: online softmax over key tiles (reduction axis last)."""
    masked = s_pad != s_true

    def kernel(q_ref, k_ref, o_ref, m_sc, l_sc, acc_sc):
        ki = pl.program_id(2)

        @pl.when(ki == 0)
        def _init():
            m_sc[...] = jnp.full_like(m_sc, _NEG_INF)
            l_sc[...] = jnp.zeros_like(l_sc)
            acc_sc[...] = jnp.zeros_like(acc_sc)

        q = _mxu_cast(q_ref[...])                                # (TQ, Dp)
        k = _mxu_cast(k_ref[...])                                # (TK, Dp)
        s = lax.dot_general(q, k, (((1,), (1,)), ((), ())),
                            preferred_element_type=jnp.float32)  # (TQ, TK) f32
        if masked:
            col = ki * tk + lax.broadcasted_iota(jnp.int32, s.shape, 1)
            s = jnp.where(col < s_true, s, _NEG_INF)

        m_prev = m_sc[...]
        m_new = jnp.maximum(m_prev, jnp.max(s, axis=-1, keepdims=True))
        alpha = jnp.exp(m_prev - m_new)
        p = jnp.exp(s - m_new)                                   # f32 exp
        l_sc[...] = alpha * l_sc[...] + jnp.sum(p, axis=-1, keepdims=True)
        acc_sc[...] = alpha * acc_sc[...] + jnp.dot(
            p.astype(k.dtype), k, preferred_element_type=jnp.float32)
        m_sc[...] = m_new

        @pl.when(ki == pl.num_programs(2) - 1)
        def _fin():
            o_ref[...] = (acc_sc[...] *
                          pl.reciprocal(l_sc[...], approx=True)).astype(o_ref.dtype)

    return kernel


# ----------------------------------------------------------------------------
# pallas_call wrappers
# ----------------------------------------------------------------------------
def _monolithic_path(xp, policy):
    B, S, Dp = xp.shape
    itemsize = jnp.dtype(xp.dtype).itemsize
    budget = policy["step_budget"]

    # Largest divisor batch tile under the per-step budget; cap at B//2 so the
    # grid keeps >= 2 steps when B >= 2 (both v7x TCs busy, pipeline overlap).
    max_tb = max(1, B // 2) if B >= 2 else 1
    tb = 1
    for cand in range(1, max_tb + 1):
        if B % cand == 0 and _monolithic_est(cand, S, Dp, itemsize) <= budget:
            tb = cand

    est = _monolithic_est(tb, S, Dp, itemsize)
    vmem_limit = policy["vmem_limit_max"] if est > 28 * _MiB else None

    return pl.pallas_call(
        _attn_block_kernel,
        out_shape=jax.ShapeDtypeStruct((B, S, Dp), xp.dtype),
        grid_spec=pltpu.PrefetchScalarGridSpec(
            num_scalar_prefetch=0,
            grid=(B // tb,),
            in_specs=[pl.BlockSpec((tb, S, Dp), lambda b: (b, 0, 0))],
            out_specs=pl.BlockSpec((tb, S, Dp), lambda b: (b, 0, 0)),
        ),
        compiler_params=pltpu.CompilerParams(
            dimension_semantics=("parallel",),
            vmem_limit_bytes=vmem_limit,
        ),
    )(xp)


def _row_tiled_path(xp, s_true, tq, policy):
    B, Sp, Dp = xp.shape
    itemsize = jnp.dtype(xp.dtype).itemsize
    est = _row_tiled_est(tq, Sp, Dp, itemsize)
    vmem_limit = policy["vmem_limit_max"] if est > 28 * _MiB else None

    return pl.pallas_call(
        _make_row_tiled_kernel(s_true, Sp),
        out_shape=jax.ShapeDtypeStruct((B, Sp, Dp), xp.dtype),
        grid_spec=pltpu.PrefetchScalarGridSpec(
            num_scalar_prefetch=0,
            grid=(B, Sp // tq),
            in_specs=[
                pl.BlockSpec((pl.Squeezed(), tq, Dp), lambda b, qi: (b, qi, 0)),
                # Same block index for every qi -> K stays resident in VMEM.
                pl.BlockSpec((pl.Squeezed(), Sp, Dp), lambda b, qi: (b, 0, 0)),
            ],
            out_specs=pl.BlockSpec((pl.Squeezed(), tq, Dp), lambda b, qi: (b, qi, 0)),
        ),
        compiler_params=pltpu.CompilerParams(
            dimension_semantics=("parallel", "parallel"),
            vmem_limit_bytes=vmem_limit,
        ),
    )(xp, xp)


def _flash_path(xp, s_true, tq, tk, policy):
    B, Sp, Dp = xp.shape
    itemsize = jnp.dtype(xp.dtype).itemsize
    est = _flash_est(tq, tk, Dp, itemsize)
    vmem_limit = policy["vmem_limit_max"] if est > 28 * _MiB else None

    return pl.pallas_call(
        _make_flash_kernel(s_true, Sp, tk),
        out_shape=jax.ShapeDtypeStruct((B, Sp, Dp), xp.dtype),
        grid_spec=pltpu.PrefetchScalarGridSpec(
            num_scalar_prefetch=0,
            grid=(B, Sp // tq, Sp // tk),
            in_specs=[
                pl.BlockSpec((pl.Squeezed(), tq, Dp), lambda b, qi, ki: (b, qi, 0)),
                # If the K DMA is still exposed after tile tuning, add
                # pipeline_mode=pl.Buffered(3) on this spec.
                pl.BlockSpec((pl.Squeezed(), tk, Dp), lambda b, qi, ki: (b, ki, 0)),
            ],
            out_specs=pl.BlockSpec((pl.Squeezed(), tq, Dp),
                                   lambda b, qi, ki: (b, qi, 0)),
            scratch_shapes=[
                pltpu.VMEM((tq, 1), jnp.float32),    # running max m
                pltpu.VMEM((tq, 1), jnp.float32),    # running denom l
                pltpu.VMEM((tq, Dp), jnp.float32),   # running accumulator
            ],
        ),
        compiler_params=pltpu.CompilerParams(
            dimension_semantics=("parallel", "parallel", "arbitrary"),
            vmem_limit_bytes=vmem_limit,
        ),
    )(xp, xp)


# ----------------------------------------------------------------------------
# Public entry point
# ----------------------------------------------------------------------------
def simple_self_attention(x, *, path=None, row_block_q=256,
                          flash_block_q=None, flash_block_k=None):
    """Parameter-free self-attention: softmax(x @ x^T, axis=-1) @ x.

    x: (B, S, D).  Returns (B, S, D) in x.dtype.
    `path` in {None, "monolithic", "row", "flash"}; None -> chip-aware choice.
    """
    B, S, D = x.shape
    policy = _chip_policy()
    itemsize = jnp.dtype(x.dtype).itemsize

    # Lane-dense feature dim (exact: zero feature columns add nothing to
    # x @ x^T and yield zero output columns that are sliced off).
    Dp = max(128, _round_up(D, 128))

    tq_flash = flash_block_q or policy["flash_tq"]
    tk_flash = flash_block_k or policy["flash_tk"]
    tq_row = min(row_block_q, _round_up(S, 8))

    if path is None:
        if (S <= policy["monolithic_max_seq"]
                and _monolithic_est(1, S, Dp, itemsize) <= policy["step_budget"]):
            path = "monolithic"
        elif _row_tiled_est(tq_row, _round_up(S, tq_row), Dp, itemsize) \
                <= policy["step_budget"]:
            path = "row"
        else:
            path = "flash"

    if path == "monolithic":
        s_pad = S
    elif path == "row":
        s_pad = _round_up(S, tq_row)
    else:
        step = (tq_flash * tk_flash) // math.gcd(tq_flash, tk_flash)
        s_pad = _round_up(S, step)

    pad_s, pad_d = s_pad - S, Dp - D
    xp = x if (pad_s == 0 and pad_d == 0) else \
        jnp.pad(x, ((0, 0), (0, pad_s), (0, pad_d)))

    if path == "monolithic":
        out = _monolithic_path(xp, policy)
    elif path == "row":
        out = _row_tiled_path(xp, S, tq_row, policy)
    else:
        out = _flash_path(xp, S, tq_flash, tk_flash, policy)

    if pad_s or pad_d:
        out = out[:, :S, :D]
    return out


def _reference(x):
    scores = jnp.matmul(x, jnp.swapaxes(x, -2, -1))
    weights = jax.nn.softmax(scores, axis=-1)
    return jnp.matmul(weights, x)


if __name__ == "__main__":
    key = jax.random.PRNGKey(0)
    k1, k2, k3 = jax.random.split(key, 3)
    tol = 3e-2  # bf16 MXU feeds + approx reciprocal vs. the f32 reference

    # Small shapes implied by the module's forward: (batch=2, seq=8, hidden=32).
    B, S, D = 2, 8, 32
    x = jax.random.normal(k1, (B, S, D), dtype=jnp.float32)
    out = jax.block_until_ready(simple_self_attention(x))
    ref = _reference(x)
    assert out.shape == (B, S, D)
    err = float(jnp.max(jnp.abs(out - ref)))
    assert err < tol, f"monolithic path mismatch vs reference: {err}"

    # Row-tiled mid-S path, exercising sequence padding + key masking.
    B2, S2, D2 = 2, 200, 48
    x2 = jax.random.normal(k2, (B2, S2, D2), dtype=jnp.float32)
    out2 = jax.block_until_ready(
        simple_self_attention(x2, path="row", row_block_q=128))
    ref2 = _reference(x2)
    assert out2.shape == (B2, S2, D2)
    err2 = float(jnp.max(jnp.abs(out2 - ref2)))
    assert err2 < tol, f"row-tiled path mismatch vs reference: {err2}"

    # Flash (online-softmax) path, exercising sequence padding + key masking.
    B3, S3, D3 = 2, 300, 64
    x3 = jax.random.normal(k3, (B3, S3, D3), dtype=jnp.float32)
    out3 = jax.block_until_ready(
        simple_self_attention(x3, path="flash",
                              flash_block_q=128, flash_block_k=128))
    ref3 = _reference(x3)
    assert out3.shape == (B3, S3, D3)
    err3 = float(jnp.max(jnp.abs(out3 - ref3)))
    assert err3 < tol, f"flash path mismatch vs reference: {err3}"

    print("KERNEL_OK")
</pallas_src>

<mosaic_0001>
module attributes {stable_mosaic.version = 11 : i64} {
  func.func @_attn_block_kernel(%arg0: i32, %arg1: memref<1x8x128xf32, #tpu.memory_space<vmem>>, %arg2: memref<1x8x128xf32, #tpu.memory_space<vmem>>) attributes {dimension_semantics = [#tpu.dimension_semantics<parallel>], iteration_bounds = array<i64: 2>, scalar_prefetch = 0 : i64, scratch_operands = 0 : i64, tpu.core_type = #tpu.core_type<tc>, window_params = [{transform_indices = @transform_0, window_bounds = array<i64: 1, 8, 128>}, {transform_indices = @transform_1, window_bounds = array<i64: 1, 8, 128>}]} {
    %c0 = arith.constant 0 : index
    %c0_0 = arith.constant 0 : index
    %c0_1 = arith.constant 0 : index
    %0 = vector.load %arg1[%c0, %c0_0, %c0_1] : memref<1x8x128xf32, #tpu.memory_space<vmem>>, vector<1x8x128xf32>
    %1 = arith.truncf %0 : vector<1x8x128xf32> to vector<1x8x128xbf16>
    %cst = arith.constant dense<0.000000e+00> : vector<1x8x8xf32>
    %2 = tpu.matmul %1, %1, %cst {dimension_numbers = #tpu.dot_dimension_numbers<[2], [2], [1], [1], [0, 0, 0, 1, 1, 1], [0], [0]>} : vector<1x8x128xbf16>, vector<1x8x128xbf16>, vector<1x8x8xf32> -> vector<1x8x8xf32>
    %cst_2 = arith.constant dense<0xFF800000> : vector<1x8xf32>
    %3 = vector.multi_reduction <maximumf>, %2, %cst_2 [2] : vector<1x8x8xf32> to vector<1x8xf32>
    %4 = vector.shape_cast %3 : vector<1x8xf32> to vector<1x8x1xf32>
    %5 = vector.broadcast %4 : vector<1x8x1xf32> to vector<1x8x8xf32>
    %6 = arith.subf %2, %5 : vector<1x8x8xf32>
    %7 = math.exp %6 : vector<1x8x8xf32>
    %cst_3 = arith.constant dense<0.000000e+00> : vector<1x8xf32>
    %8 = vector.multi_reduction <add>, %7, %cst_3 [2] : vector<1x8x8xf32> to vector<1x8xf32>
    %9 = vector.shape_cast %8 : vector<1x8xf32> to vector<1x8x1xf32>
    %10 = arith.truncf %7 : vector<1x8x8xf32> to vector<1x8x8xbf16>
    %cst_4 = arith.constant dense<0.000000e+00> : vector<1x8x128xf32>
    %11 = tpu.matmul %10, %1, %cst_4 {dimension_numbers = #tpu.dot_dimension_numbers<[2], [1], [1], [2], [0, 0, 0, 1, 1, 2], [0], [0]>} : vector<1x8x8xbf16>, vector<1x8x128xbf16>, vector<1x8x128xf32> -> vector<1x8x128xf32>
    %12 = tpu.reciprocal %9 {approx = true} : vector<1x8x1xf32> -> vector<1x8x1xf32>
    %13 = vector.broadcast %12 : vector<1x8x1xf32> to vector<1x8x128xf32>
    %14 = arith.mulf %11, %13 : vector<1x8x128xf32>
    %c0_5 = arith.constant 0 : index
    %c0_6 = arith.constant 0 : index
    %c0_7 = arith.constant 0 : index
    %15 = vector.load %arg2[%c0_5, %c0_6, %c0_7] : memref<1x8x128xf32, #tpu.memory_space<vmem>>, vector<1x8x128xf32>
    tpu.vector_store %arg2[%c0_5, %c0_6, %c0_7], %14 {strides = array<i32>} : memref<1x8x128xf32, #tpu.memory_space<vmem>>, vector<1x8x128xf32>,
    return
  }
  func.func @transform_0(%arg0: i32) -> (i32, i32, i32) {
    %c0_i32 = arith.constant 0 : i32
    %c0_i32_0 = arith.constant 0 : i32
    %c0_i32_1 = arith.constant 0 : i32
    return %arg0, %c0_i32, %c0_i32_0 : i32, i32, i32
  }
  func.func @transform_1(%arg0: i32) -> (i32, i32, i32) {
    %c0_i32 = arith.constant 0 : i32
    %c0_i32_0 = arith.constant 0 : i32
    %c0_i32_1 = arith.constant 0 : i32
    return %arg0, %c0_i32, %c0_i32_0 : i32, i32, i32
  }
}

</mosaic_0001>

<bundles_post_ra>
// kernel: tpu_custom_call.1
= control target key start
LH: loop header
LB: loop body
LE: loop exit
PB: predicated region body
PF: predicated region fallthrough
CT: control target
= control target key end

     0   :  { %6 = vsyncpa [#allocation3], 0  ;;  %s575_s0 = inlined_call_operand.hbm [shape: f32[2,8,128], index: 0, kind: input, shape index: {}]   ;;  %s576_s1 = inlined_call_operand.hbm [shape: f32[2,8,128], index: 1, kind: output, shape index: {}]  }
   0x1   :  { %8 = vsyncpa [#allocation3 + $0x1], 0 }
   0x2   :  { %9 = vsyncpa [#allocation4], 0 }
   0x3   :  { %11 = vsyncpa [#allocation4 + $0x1], 0  ;;  %s441_s6 = smov 0   ;;  %s443_s7 = smov 0  }
   0x4   :  { %s445_s8 = smov 0   ;;  %s447_s9 = smov 0  }
   0x5 LB: > { %s462_s10 = sadd.s32 4294967295, %s429_s9   ;;  %s270_s11 = sadd.s32 4294967294, %s429_s9   ;;  %s429_s9 = sphi %s447_s9, %s586_s9   ;;  %s425_s8 = sphi %s445_s8, %s585_s8   ;;  %s421_s7 = sphi %s443_s7, %s584_s7   ;;  %s417_s6 = sphi %s441_s6, %s583_s6  }
   0x6   : > { %s466_s12 = sadd.s32 1, %s429_s9   ;;  %s24_s13 = sadd.s32 1, %s425_s8 }
   0x7   : > { %s21_s14 = ssub.s32 %s429_s9, %s466_s12  ;;  %p31_p0 = scmp.ne.s32.totalorder %s425_s8, %s421_s7 }
   0x8   : > { %p22_p1 = scmp.eq.s32.totalorder %s21_s14, 0  ;;  %p32_p2 = scmp.eq.s32.totalorder %s429_s9, 0 }
   0x9   : > { %p37_p3 = scmp.ne.s32.totalorder %s421_s7, %s417_s6  ;;  %p38_p4 = scmp.eq.s32.totalorder %s462_s10, 0 }
   0xa   : > { %s478_s15 = scalar_select %p22_p1, %s425_s8, %s24_s13  }
   0xb   : > { %p480_p5 = por %p32_p2, %p31_p0  ;;  %p484_p6 = por %p38_p4, %p37_p3 }
   0xc   : > { %p61_p7 = scmp.eq.s32.totalorder %s462_s10, 1  ;;  %p67_p8 = scmp.eq.s32.totalorder %s270_s11, 1 }
   0xd   : > { %p295_p10 = scmp.lt.s32.totalorder %s429_s9, 2  ;;  %s87_s20 = sand.u32 1, %s425_s8  }
   0xe   : > { %p491_p11 = por %p61_p7, %p31_p0  ;;  %p495_p12 = por %p67_p8, %p37_p3 }
   0xf   : > { %s274_s21 = sshll.u32 %s429_s9, 3  ;;  %s273_s22 = sshll.u32 %s87_s20, 3 }
  0x10   : > { %s95_s25 = scalar_lea.hbm %s575_s0, %s274_s21  ;;  %s91_s27 = scalar_lea.vmem [#allocation2], %s273_s22 }
  0x11   : > { %s97_s26 = sshll.u32 %s95_s25, 4  ;;  %s99_s28 = sshll.u32 %s91_s27, 4  ;;  %s98_s26 = int_to_ptr.hbm [resolvable:$true] %s97_s26  ;;  %s100_s28 = int_to_ptr.vmem [resolvable:$true] %s99_s28 }
  0x12   : > { %p506_p13 = pnand %p295_p10, %p480_p5  ;;  %p275_p0 = scmp.ge.s32.totalorder %s429_s9, 1 }
  0x13   : > { %p104_p1 = scmp.lt.s32.totalorder %s429_s9, 3  ;;  %s88_s30 = scalar_lea.sflag [#allocation3], %s87_s20 }
  0x14   : > { %s333_s2 = sshra.s32 %s98_s26, 4  ;;  %p337_p3 = pneg %p506_p13  ;;  %s334_s2 = int_to_ptr.hbm [resolvable:$true] %s333_s2 }
  0x15   : > { %s335_s3 = scalar_lea.hbm %s334_s2, 8  ;;  %s340_s11 = scalar_lea.hbm %s575_s0, 16 }
  0x16   : > { %p336_p2 = scmp.ne.s32.totalorder %s334_s2, %s335_s3  ;;  %p341_p5 = scmp.lt.s32.totalorder %s334_s2, %s575_s0 }
  0x17   : > { %p342_p8 = scmp.lt.s32.totalorder %s340_s11, %s335_s3 }
  0x18   : > { %p338_p4 = pnand %p337_p3, %p336_p2 }
  0x19   : > { %p343_p10 = por %p342_p8, %p341_p5 }
  0x1a   : > { %p339_p7 = pneg %p338_p4 }
  0x1c   : > { %p344_p9 = pnand %p343_p10, %p339_p7 }
  0x1e   : > { %347 = shalt.err (!%p344_p9)
}
  0x1f   : > { %290 = dma.hbm_to_vmem [thread:$0]  (!%p506_p13), %s98_s26, 128, %s100_s28, %s88_s30  }
  0x20   : > { %p105_p2 = pnand %p275_p0, %p104_p1 }
  0x21   : > { %s527_s16 = sand.u32 (!%p105_p2), 1, %s421_s7  }
  0x22   : > { %108 = sbr.rel (%p105_p2) target bundleno = 440 (0x1b8), region = 24  ;;  %s276_s20 = sshll.u32 (!%p105_p2), %s527_s16, 3 }
  0x23   : > { %s111_s21 = scalar_lea.sflag (!%p105_p2), [#allocation3], %s527_s16  ;;  %s114_s22 = scalar_lea.vmem (!%p105_p2), [#allocation2], %s276_s20 }
  0x27   : > { %408 = dma.done.wait (%p484_p6), %s111_s21, 128  }
  0x28   : > { %410 = vsyncadd (%p484_p6), %s111_s21, 4294967168  ;;  %v135_v0 = vld [vmem:[%s114_s22] sm:$0xff]  ;;  %vm150_vm0 = vcmask 64512   ;;  %vm164_vm1 = vcmask 1043456   ;;  %s280_s17 = sshll.u32 %s462_s10, 3  ;;  %s133_s26 = scalar_lea.vmem [#allocation5], %s276_s20 }
  0x29   : > { %v136_v1 = vpack.c.bf16 %v135_v0, %v135_v0  ;;  %s195_s25 = scalar_lea.hbm %s576_s1, %s280_s17  ;;  %s197_s27 = sshll.u32 %s133_s26, 4  ;;  %s198_s27 = int_to_ptr.vmem [resolvable:$true] %s197_s27 }
  0x2a   : > { %s199_s28 = sshll.u32 %s195_s25, 4  ;;  %s185_s29 = scalar_lea.sflag [#allocation4], %s527_s16  ;;  %s200_s28 = int_to_ptr.hbm [resolvable:$true] %s199_s28 }
  0x2b   : > { %144 = vmatpush.bf16.xpose.msra.mxu0 %v136_v1  ;;  %v166_v5 = vsel %vm164_vm1, %v136_v1, 0  ;;  %s377_s30 = sshra.s32 %s200_s28, 4  ;;  %s383_s4 = scalar_lea.hbm %s576_s1, 16  ;;  %s378_s30 = int_to_ptr.hbm [resolvable:$true] %s377_s30 }
  0x2c   : > { %175 = vmatpush.bf16.msra.mxu1 %v166_v5  ;;  %s379_s10 = scalar_lea.hbm %s378_s30, 8  ;;  %p384_p0 = scmp.lt.s32.totalorder %s378_s30, %s576_s1 }
  0x2d   : > { %p380_p6 = scmp.ne.s32.totalorder %s378_s30, %s379_s10  ;;  %p385_p1 = scmp.lt.s32.totalorder %s383_s4, %s379_s10 }
  0x2f   : > { %p381_p9 = pnand %p380_p6, %p491_p11  ;;  %p386_p3 = por %p385_p1, %p384_p0 }
  0x31   : > { %p382_p13 = pneg %p381_p9 }
  0x32   : > { %145 = vmatmul.bf16.vlgmr.msra.gmra.mxu0 %v136_v1 }
  0x33   : > { %p387_p4 = pnand %p386_p3, %p382_p13 }
  0xaf   : > { %v146_v2 = vpop.f32.mrf.mxu0 }
  0xb0   : > { %v151_v3 = vsel %vm150_vm0, %v146_v2, -inf }
  0xb1   : > { %152 = vmax.xlane.f32.xlu0 %v151_v3 }
  0xb7   : > { %v148_v4 = vpop.f32.mrf.mxu0 }
 0x124   : > { %v153_v6 = vpop.xlane.xlu0 %152 }
 0x125   : > { %v154_v7 = vsub.f32 %v146_v2, %v153_v6 }
 0x127   : > { %v155_v8 = vmul.f32 1.442695, %v154_v7 }
 0x129   : > { %329 = vpow2.f32 %v155_v8 }
 0x12f   : > { %v330_v9 = vpop.eup %329 }
 0x130   : > { %v157_v10 = vsel %vm150_vm0, %v330_v9, 0.0  ;;  %v160_v11 = vpack.c.bf16 %v330_v9, %v330_v9 }
 0x131   : > { %158 = vadd.xlane.f32.xlu0 %v157_v10 }
 0x132   : > { %278 = vmatmul.msk.bf16.vlgmr.msra.gmra.mxu1 %vm150_vm0, %v160_v11 }
 0x1a4   : > { %v159_v12 = vpop.xlane.xlu0 %158 }
 0x1a5   : > { %331 = vrcp.f32 %v159_v12 }
 0x1ab   : > { %v332_v13 = vpop.eup %331 }
 0x1af   : > { %v177_v14 = vpop.f32.mrf.mxu1 }
 0x1b0   : > { %v182_v15 = vmul.f32 %v332_v13, %v177_v14 }
 0x1b2   : > { %183 = vst [vmem:[%s133_s26] sm:$0xff] %v182_v15 }
 0x1b3   : > { %390 = shalt.err (!%p387_p4)
}
 0x1b4   : > { %285 = dma.vmem_to_hbm [thread:$0]  (%p491_p11), %s198_s27, 128, %s200_s28, %s185_s29  }
 0x1b7   : > { %v179_v16 = vpop.f32.mrf.mxu1 }
 0x1b8 PF: > { %s211_s13 = sand.u32 1, %s417_s6   ;;  %p582_p7 = scmp.ge.s32.totalorder %s429_s9, 2 }
 0x1b9   : > { %s212_s14 = scalar_lea.sflag [#allocation4], %s211_s13 }
 0x1ba   : > { %p292_p5 = pnand %p582_p7, %p495_p12 }
 0x1bc   : > { %p293_p8 = pneg %p292_p5 }
 0x1be   : > { %412 = dma.done.wait (%p293_p8), %s212_s14, 128  }
 0x1bf   : > { %414 = vsyncadd (%p293_p8), %s212_s14, 4294967168  ;;  %p14_p10 = scmp.ge.s32.totalorder %s466_s12, 4   ;;  %s583_s6 = smov %s421_s7 }
 0x1c0   : > { %s584_s7 = smov %s425_s8  ;;  %s585_s8 = smov %s478_s15 }
 0x1c1   : > { %s586_s9 = smov %s466_s12  ;;  %16 = sbr.rel (!%p14_p10) target bundleno = 5 (0x5), region = 69 }
 0x1c6   :  { %218 = vsyncpa [#allocation3], 1 }
 0x1c7   :  { %220 = vsyncpa [#allocation3 + $0x1], 1 }
 0x1c8   :  { %221 = vsyncpa [#allocation4], 1 }
 0x1c9   :  { %223 = vsyncpa [#allocation4 + $0x1], 1 }

</bundles_post_ra>
